<compile_context>
chip_gen: v7x
topology: tpu7x:2x2x1
jax: 0.10.0
libtpu: 0.0.40
codegen_flags: <defaults>
</compile_context>

<pallas_src>
import numpy as np
import jax
import jax.numpy as jnp
from jax import lax
from jax.experimental import pallas as pl
from jax.experimental.pallas import tpu as pltpu

# --- db4 decomposition filters (pywt.Wavelet('db4').dec_lo / dec_hi), hardcoded
#     so the script needs no pywt.  DWT1D uses them reversed (dec_lo[::-1]).
DB4_DEC_LO = np.array([
    -0.010597401784997278, 0.032883011666982945, 0.030841381835986965,
    -0.18703481171888114, -0.02798376941698385, 0.6308807679295904,
    0.7148465705525415, 0.23037781330885523], dtype=np.float64)
DB4_DEC_HI = np.array([
    -0.23037781330885523, 0.7148465705525415, -0.6308807679295904,
    -0.02798376941698385, 0.18703481171888114, 0.030841381835986965,
    0.032883011666982945, -0.010597401784997278], dtype=np.float64)


def dwt_level_operator(L_in, filt_lo, filt_hi):
    """Matrix form of DWT1D.forward for one level: cA = A_lo @ sig, cD = A_hi @ sig.

    Matches F.conv1d(x, filt, stride=2, padding=K//2, groups=C) including the
    replicate-pad branch used when L_in < K.
    """
    K = len(filt_lo)
    pad = K // 2
    if L_in < K:  # replicate pad (same as F.pad(..., mode='replicate'))
        diff = K - L_in
        pl_, _pr = diff // 2, diff - diff // 2
        Lc = L_in + diff
        R = np.zeros((Lc, L_in), dtype=np.float64)
        for j in range(Lc):
            R[j, min(max(j - pl_, 0), L_in - 1)] = 1.0
    else:
        Lc = L_in
        R = np.eye(L_in, dtype=np.float64)
    L_out = (Lc + 2 * pad - K) // 2 + 1
    A_lo = np.zeros((L_out, Lc), dtype=np.float64)
    A_hi = np.zeros((L_out, Lc), dtype=np.float64)
    for t in range(L_out):
        for k in range(K):
            i = 2 * t + k - pad
            if 0 <= i < Lc:
                A_lo[t, i] += filt_lo[k]
                A_hi[t, i] += filt_hi[k]
    return A_lo @ R, A_hi @ R, L_out


def linear_interp_operator(L_in, L_out):
    """Matrix form of F.interpolate(mode='linear', align_corners=False)."""
    W = np.zeros((L_out, L_in), dtype=np.float64)
    scale = L_in / L_out
    for i in range(L_out):
        src = scale * (i + 0.5) - 0.5
        if src < 0.0:
            src = 0.0
        i0 = min(int(np.floor(src)), L_in - 1)
        i1 = i0 + 1 if i0 < L_in - 1 else i0
        w1 = src - i0
        W[i, i0] += 1.0 - w1
        W[i, i1] += w1
    return W


def build_folded_time_operators(T, levels):
    """Fold DWT chain + final detail + linear interp into two (T, T) operators."""
    filt_lo = DB4_DEC_LO[::-1]
    filt_hi = DB4_DEC_HI[::-1]
    L = T
    lo_ops = []
    hi_last = None
    for _ in range(levels):
        A_lo, A_hi, L_out = dwt_level_operator(L, filt_lo, filt_hi)
        lo_ops.append(A_lo)
        hi_last = A_hi
        L = L_out
    W_interp = linear_interp_operator(L, T)          # (T, L_final)
    chain = np.eye(T)
    for A in lo_ops[:-1]:
        chain = A @ chain                            # approximation chain up to last level
    Wa_full = W_interp @ (lo_ops[-1] @ chain)        # (T, T): x -> cA_up
    Wd_full = W_interp @ (hi_last @ chain)           # (T, T): x -> cD_up
    return Wa_full, Wd_full, lo_ops, hi_last, W_interp


# ----------------------------- Pallas kernel --------------------------------
def _mlwb_kernel(x_ref, wul_ref, rs_ref, bc_ref, g_ref, b_ref, o_ref):
    f32 = jnp.float32
    BB, T, D = x_ref.shape
    w_ul = wul_ref[...]       # (2T, T) f32 left operator [Wa; Wd]  (tiny)
    r_stack = rs_ref[...]     # (2D, D) bf16 stacked right operator [Ra; Rd]
    bias = bc_ref[...]        # (1, D)  f32 combined bias
    gamma = g_ref[...]        # (1, D)  f32
    beta = b_ref[...]         # (1, D)  f32
    inv_d = 1.0 / D
    # Static unroll over the batch sub-block: no block-diagonal operator, and
    # the right-matmul + LayerNorm epilogue is chunked T rows at a time so the
    # f32 intermediates stay in vregs.  (For very large T, chunk rows further.)
    for b in range(BB):
        xb = x_ref[b]                                               # (T, D) f32
        # One small MXU pass: stacked [cA_up; cD_up] over the time axis.
        up = jnp.dot(w_ul, xb, preferred_element_type=f32)          # (2T, D) f32
        # Lane-concat of the two 128-lane-aligned halves -> single K=2D matmul
        # (fills the 256-deep MXU on v6e/v7x; single bf16 quantization point).
        cat = jnp.concatenate([up[:T], up[T:]], axis=-1).astype(jnp.bfloat16)
        fused = jnp.dot(cat, r_stack, preferred_element_type=f32) + bias
        # LayerNorm over model_dim (f32; sum*(1/D) instead of mean; rsqrt on EUP).
        mean = jnp.sum(fused, axis=-1, keepdims=True) * inv_d
        xc = fused - mean
        var = jnp.sum(xc * xc, axis=-1, keepdims=True) * inv_d
        normed = xc * lax.rsqrt(var + 1e-5)
        o_ref[b] = (normed * gamma + beta).astype(o_ref.dtype)


def multi_level_wavelet_block(x, w_ul, r_stack, b_comb, gamma, beta, *,
                              batch_block=1, out_dtype=jnp.float32,
                              single_buffer_consts=True):
    """x: (B, T, D) f32.  w_ul: (2T, T) f32.  r_stack: (2D, D) bf16."""
    B, T, D = x.shape
    BB = batch_block
    assert B % BB == 0, "batch_block must divide batch"
    # cA/cD split of `up` must stay (8,128)-tile aligned.
    assert T % 8 == 0, "pad T to a multiple of 8 (16 for bf16 operands)"
    assert w_ul.shape == (2 * T, T)
    assert r_stack.shape == (2 * D, D)

    def const_spec(a):
        n = a.ndim
        idx = lambda b, _n=n: (0,) * _n
        if single_buffer_consts and hasattr(pl, "Buffered"):
            # Constant-index operands are revisited every grid step;
            # double-buffering them is pure VMEM waste.
            return pl.BlockSpec(a.shape, idx, pipeline_mode=pl.Buffered(1))
        return pl.BlockSpec(a.shape, idx)

    # Explicit VMEM budget: double-buffered x/out blocks + single-buffered
    # constants + live f32 intermediates, with headroom.  Clamped to stay
    # inside v7x's 64 MiB physical VMEM.
    out_bytes = np.dtype(out_dtype).itemsize
    block_bytes = BB * T * D * 4 * 2 + BB * T * D * out_bytes * 2
    const_bytes = 2 * T * T * 4 + 2 * D * D * 2 + 3 * D * 4
    live_bytes = 2 * T * D * 4 + T * 2 * D * 2 + 2 * T * D * 4
    vmem_limit = int(min(64 << 20,
                         max(32 << 20, 4 * (block_bytes + const_bytes + live_bytes))))

    return pl.pallas_call(
        _mlwb_kernel,
        out_shape=jax.ShapeDtypeStruct((B, T, D), out_dtype),
        grid=(B // BB,),
        in_specs=[pl.BlockSpec((BB, T, D), lambda b: (b, 0, 0)),
                  const_spec(w_ul), const_spec(r_stack),
                  const_spec(b_comb), const_spec(gamma), const_spec(beta)],
        out_specs=pl.BlockSpec((BB, T, D), lambda b: (b, 0, 0)),
        compiler_params=pltpu.CompilerParams(
            dimension_semantics=("parallel",),
            vmem_limit_bytes=vmem_limit),
    )(x, w_ul, r_stack, b_comb, gamma, beta)


# ------------------------- pure-JAX references (sanity) ----------------------
def ref_forward(x, lo_ops, hi_last, W_interp, WcA, bcA, WcD, bcD, Wf, bfu, gamma, beta):
    """Unfused f32 reference that mirrors the PyTorch module structure."""
    D = x.shape[-1]
    apply_t = lambda A, s: jnp.einsum('ij,bjd->bid', jnp.asarray(A, jnp.float32), s)
    cur = x
    for A in lo_ops[:-1]:
        cur = apply_t(A, cur)
    ca = apply_t(lo_ops[-1], cur)
    cd = apply_t(hi_last, cur)
    ca_up = apply_t(W_interp, ca)
    cd_up = apply_t(W_interp, cd)
    pa = ca_up @ WcA.T + bcA
    pd = cd_up @ WcD.T + bcD
    fused = pa @ Wf[:, :D].T + pd @ Wf[:, D:].T + bfu
    mean = fused.mean(-1, keepdims=True)
    xc = fused - mean
    var = (xc * xc).mean(-1, keepdims=True)
    return xc * lax.rsqrt(var + 1e-5) * gamma + beta


def fused_ref(x, w_ul, r_stack, b_comb, gamma, beta):
    """Pure-JAX replica of the exact folded / quantized kernel math."""
    B, T, D = x.shape
    up = jnp.einsum('st,btd->bsd', w_ul.astype(jnp.float32), x)        # (B, 2T, D)
    cat = jnp.concatenate([up[:, :T], up[:, T:]], axis=-1)             # (B, T, 2D)
    cat = cat.astype(jnp.bfloat16).astype(jnp.float32)
    fused = jnp.einsum('bte,ed->btd', cat, r_stack.astype(jnp.float32)) + b_comb
    mean = fused.mean(-1, keepdims=True)
    xc = fused - mean
    var = (xc * xc).mean(-1, keepdims=True)
    return xc * lax.rsqrt(var + 1e-5) * gamma + beta


if __name__ == "__main__":
    B, T, D, LEVELS = 2, 32, 128, 3

    # Static time-axis operators, folded host-side in f64.
    Wa_full, Wd_full, lo_ops, hi_last, W_interp = build_folded_time_operators(T, LEVELS)

    # Deterministic synthetic parameters (shapes from the nn.Module __init__).
    key = jax.random.PRNGKey(0)
    ks = jax.random.split(key, 9)
    scale = 1.0 / np.sqrt(D)
    WcA = jax.random.normal(ks[0], (D, D), jnp.float32) * scale        # (out, in)
    bcA = jax.random.normal(ks[1], (1, D), jnp.float32) * 0.1
    WcD = jax.random.normal(ks[2], (D, D), jnp.float32) * scale
    bcD = jax.random.normal(ks[3], (1, D), jnp.float32) * 0.1
    Wf = jax.random.normal(ks[4], (D, 2 * D), jnp.float32) * (1.0 / np.sqrt(2 * D))
    bfu = jax.random.normal(ks[5], (1, D), jnp.float32) * 0.1
    gamma = 1.0 + 0.1 * jax.random.normal(ks[6], (1, D), jnp.float32)
    beta = 0.1 * jax.random.normal(ks[7], (1, D), jnp.float32)
    x = jax.random.normal(ks[8], (B, T, D), jnp.float32)

    # Host-side folding (f64) of projection + fusion weights into R_stack / b_comb.
    WcA64, WcD64 = np.asarray(WcA, np.float64), np.asarray(WcD, np.float64)
    Wf64 = np.asarray(Wf, np.float64)
    Ra = WcA64.T @ Wf64[:, :D].T                     # (D, D)
    Rd = WcD64.T @ Wf64[:, D:].T                     # (D, D)
    b_comb = (np.asarray(bcA, np.float64) @ Wf64[:, :D].T
              + np.asarray(bcD, np.float64) @ Wf64[:, D:].T
              + np.asarray(bfu, np.float64))         # (1, D)

    # Kernel operands: single (2T, T) f32 left operator (no kron), and a single
    # (2D, D) bf16 stacked right operator for the K=2D fused matmul.
    w_ul = jnp.asarray(np.concatenate([Wa_full, Wd_full], axis=0), jnp.float32)
    r_stack = jnp.asarray(np.concatenate([Ra, Rd], axis=0), jnp.bfloat16)
    b_comb_f = jnp.asarray(b_comb, jnp.float32)

    # batch_block < B so the grid has >= 2 steps: software pipelining of the
    # x/out DMAs and both TensorCores usable on v7x.  Re-derive per generation.
    BB = 1
    try:
        out = jax.block_until_ready(
            multi_level_wavelet_block(x, w_ul, r_stack, b_comb_f, gamma, beta,
                                      batch_block=BB, single_buffer_consts=True))
    except Exception:
        # Fallback if this jax build rejects pipeline_mode=pl.Buffered(1).
        out = jax.block_until_ready(
            multi_level_wavelet_block(x, w_ul, r_stack, b_comb_f, gamma, beta,
                                      batch_block=BB, single_buffer_consts=False))
    out_np = np.asarray(out)

    with jax.default_matmul_precision("float32"):
        ref_fused = jax.block_until_ready(
            fused_ref(x, w_ul, r_stack, b_comb_f, gamma, beta))
        ref_exact = jax.block_until_ready(
            ref_forward(x, lo_ops, hi_last, W_interp,
                        WcA, bcA, WcD, bcD, Wf, bfu, gamma, beta))

    # Mechanics check: kernel vs identically-quantized pure-JAX path.
    np.testing.assert_allclose(out_np, np.asarray(ref_fused), rtol=1.5e-2, atol=1.5e-2)
    # Semantic check vs unfused f32 module math (bf16 right-operand quantization).
    np.testing.assert_allclose(out_np, np.asarray(ref_exact), rtol=2.5e-2, atol=2.5e-2)
    print("KERNEL_OK")
</pallas_src>

<mosaic_0001>
module attributes {stable_mosaic.version = 11 : i64} {
  func.func @_mlwb_kernel(%arg0: i32, %arg1: memref<1x32x128xf32, #tpu.memory_space<vmem>>, %arg2: memref<64x32xf32, #tpu.memory_space<vmem>>, %arg3: memref<256x128xbf16, #tpu.memory_space<vmem>>, %arg4: memref<1x128xf32, #tpu.memory_space<vmem>>, %arg5: memref<1x128xf32, #tpu.memory_space<vmem>>, %arg6: memref<1x128xf32, #tpu.memory_space<vmem>>, %arg7: memref<1x32x128xf32, #tpu.memory_space<vmem>>) attributes {dimension_semantics = [#tpu.dimension_semantics<parallel>], iteration_bounds = array<i64: 2>, scalar_prefetch = 0 : i64, scratch_operands = 0 : i64, tpu.core_type = #tpu.core_type<tc>, window_params = [{transform_indices = @transform_0, window_bounds = array<i64: 1, 32, 128>}, {pipeline_mode = #tpu.pipeline_mode<synchronous>, transform_indices = @transform_1, window_bounds = array<i64: 64, 32>}, {pipeline_mode = #tpu.pipeline_mode<synchronous>, transform_indices = @transform_2, window_bounds = array<i64: 256, 128>}, {pipeline_mode = #tpu.pipeline_mode<synchronous>, transform_indices = @transform_3, window_bounds = array<i64: 1, 128>}, {pipeline_mode = #tpu.pipeline_mode<synchronous>, transform_indices = @transform_4, window_bounds = array<i64: 1, 128>}, {pipeline_mode = #tpu.pipeline_mode<synchronous>, transform_indices = @transform_5, window_bounds = array<i64: 1, 128>}, {transform_indices = @transform_6, window_bounds = array<i64: 1, 32, 128>}]} {
    %c0 = arith.constant 0 : index
    %c0_0 = arith.constant 0 : index
    %0 = vector.load %arg2[%c0, %c0_0] : memref<64x32xf32, #tpu.memory_space<vmem>>, vector<64x32xf32>
    %c0_1 = arith.constant 0 : index
    %c0_2 = arith.constant 0 : index
    %1 = vector.load %arg3[%c0_1, %c0_2] : memref<256x128xbf16, #tpu.memory_space<vmem>>, vector<256x128xbf16>
    %c0_3 = arith.constant 0 : index
    %c0_4 = arith.constant 0 : index
    %2 = vector.load %arg4[%c0_3, %c0_4] : memref<1x128xf32, #tpu.memory_space<vmem>>, vector<1x128xf32>
    %c0_5 = arith.constant 0 : index
    %c0_6 = arith.constant 0 : index
    %3 = vector.load %arg5[%c0_5, %c0_6] : memref<1x128xf32, #tpu.memory_space<vmem>>, vector<1x128xf32>
    %c0_7 = arith.constant 0 : index
    %c0_8 = arith.constant 0 : index
    %4 = vector.load %arg6[%c0_7, %c0_8] : memref<1x128xf32, #tpu.memory_space<vmem>>, vector<1x128xf32>
    %c0_9 = arith.constant 0 : index
    %c0_10 = arith.constant 0 : index
    %c0_11 = arith.constant 0 : index
    %5 = vector.load %arg1[%c0_9, %c0_10, %c0_11] : memref<1x32x128xf32, #tpu.memory_space<vmem>>, vector<1x32x128xf32>
    %6 = vector.shape_cast %5 : vector<1x32x128xf32> to vector<32x128xf32>
    %cst = arith.constant dense<0.000000e+00> : vector<64x128xf32>
    %7 = tpu.matmul %0, %6, %cst {dimension_numbers = #tpu.dot_dimension_numbers<[1], [0], [0], [1], [0, 0, 1, 1], [], []>} : vector<64x32xf32>, vector<32x128xf32>, vector<64x128xf32> -> vector<64x128xf32>
    %8 = vector.extract_strided_slice %7 {offsets = [0, 0], sizes = [32, 128], strides = [1, 1]} : vector<64x128xf32> to vector<32x128xf32>
    %9 = vector.extract_strided_slice %7 {offsets = [32, 0], sizes = [32, 128], strides = [1, 1]} : vector<64x128xf32> to vector<32x128xf32>
    %10 = tpu.concatenate %8, %9 in 1 : vector<32x128xf32>, vector<32x128xf32> -> vector<32x256xf32>
    %11 = arith.truncf %10 : vector<32x256xf32> to vector<32x256xbf16>
    %cst_12 = arith.constant dense<0.000000e+00> : vector<32x128xf32>
    %12 = tpu.matmul %11, %1, %cst_12 {dimension_numbers = #tpu.dot_dimension_numbers<[1], [0], [0], [1], [0, 0, 1, 1], [], []>} : vector<32x256xbf16>, vector<256x128xbf16>, vector<32x128xf32> -> vector<32x128xf32>
    %13 = vector.broadcast %2 : vector<1x128xf32> to vector<32x128xf32>
    %14 = arith.addf %12, %13 : vector<32x128xf32>
    %cst_13 = arith.constant dense<0.000000e+00> : vector<32xf32>
    %15 = vector.multi_reduction <add>, %14, %cst_13 [1] : vector<32x128xf32> to vector<32xf32>
    %16 = vector.shape_cast %15 : vector<32xf32> to vector<32x1xf32>
    %cst_14 = arith.constant 7.812500e-03 : f32
    %17 = vector.broadcast %cst_14 : f32 to vector<32x1xf32>
    %18 = arith.mulf %16, %17 : vector<32x1xf32>
    %19 = vector.broadcast %18 : vector<32x1xf32> to vector<32x128xf32>
    %20 = arith.subf %14, %19 : vector<32x128xf32>
    %21 = arith.mulf %20, %20 : vector<32x128xf32>
    %cst_15 = arith.constant dense<0.000000e+00> : vector<32xf32>
    %22 = vector.multi_reduction <add>, %21, %cst_15 [1] : vector<32x128xf32> to vector<32xf32>
    %23 = vector.shape_cast %22 : vector<32xf32> to vector<32x1xf32>
    %cst_16 = arith.constant 7.812500e-03 : f32
    %24 = vector.broadcast %cst_16 : f32 to vector<32x1xf32>
    %25 = arith.mulf %23, %24 : vector<32x1xf32>
    %cst_17 = arith.constant 9.99999974E-6 : f32
    %26 = vector.broadcast %cst_17 : f32 to vector<32x1xf32>
    %27 = arith.addf %25, %26 : vector<32x1xf32>
    %28 = math.rsqrt %27 : vector<32x1xf32>
    %29 = vector.broadcast %28 : vector<32x1xf32> to vector<32x128xf32>
    %30 = arith.mulf %20, %29 : vector<32x128xf32>
    %31 = vector.broadcast %3 : vector<1x128xf32> to vector<32x128xf32>
    %32 = arith.mulf %30, %31 : vector<32x128xf32>
    %33 = vector.broadcast %4 : vector<1x128xf32> to vector<32x128xf32>
    %34 = arith.addf %32, %33 : vector<32x128xf32>
    %c0_18 = arith.constant 0 : index
    %c0_19 = arith.constant 0 : index
    %c0_20 = arith.constant 0 : index
    %35 = vector.load %arg7[%c0_18, %c0_19, %c0_20] : memref<1x32x128xf32, #tpu.memory_space<vmem>>, vector<1x32x128xf32>
    %36 = vector.shape_cast %35 : vector<1x32x128xf32> to vector<32x128xf32>
    %37 = vector.shape_cast %34 : vector<32x128xf32> to vector<1x32x128xf32>
    tpu.vector_store %arg7[%c0_18, %c0_19, %c0_20], %37 {strides = array<i32>} : memref<1x32x128xf32, #tpu.memory_space<vmem>>, vector<1x32x128xf32>,
    return
  }
  func.func @transform_0(%arg0: i32) -> (i32, i32, i32) {
    %c0_i32 = arith.constant 0 : i32
    %c0_i32_0 = arith.constant 0 : i32
    %c0_i32_1 = arith.constant 0 : i32
    return %arg0, %c0_i32, %c0_i32_0 : i32, i32, i32
  }
  func.func @transform_1(%arg0: i32) -> (i32, i32) {
    %c0_i32 = arith.constant 0 : i32
    %c0_i32_0 = arith.constant 0 : i32
    %c0_i32_1 = arith.constant 0 : i32
    return %c0_i32, %c0_i32_0 : i32, i32
  }
  func.func @transform_2(%arg0: i32) -> (i32, i32) {
    %c0_i32 = arith.constant 0 : i32
    %c0_i32_0 = arith.constant 0 : i32
    %c0_i32_1 = arith.constant 0 : i32
    return %c0_i32, %c0_i32_0 : i32, i32
  }
  func.func @transform_3(%arg0: i32) -> (i32, i32) {
    %c0_i32 = arith.constant 0 : i32
    %c0_i32_0 = arith.constant 0 : i32
    %c0_i32_1 = arith.constant 0 : i32
    return %c0_i32, %c0_i32_0 : i32, i32
  }
  func.func @transform_4(%arg0: i32) -> (i32, i32) {
    %c0_i32 = arith.constant 0 : i32
    %c0_i32_0 = arith.constant 0 : i32
    %c0_i32_1 = arith.constant 0 : i32
    return %c0_i32, %c0_i32_0 : i32, i32
  }
  func.func @transform_5(%arg0: i32) -> (i32, i32) {
    %c0_i32 = arith.constant 0 : i32
    %c0_i32_0 = arith.constant 0 : i32
    %c0_i32_1 = arith.constant 0 : i32
    return %c0_i32, %c0_i32_0 : i32, i32
  }
  func.func @transform_6(%arg0: i32) -> (i32, i32, i32) {
    %c0_i32 = arith.constant 0 : i32
    %c0_i32_0 = arith.constant 0 : i32
    %c0_i32_1 = arith.constant 0 : i32
    return %arg0, %c0_i32, %c0_i32_0 : i32, i32, i32
  }
}

module attributes {stable_mosaic.version = 11 : i64} {
  func.func @_mlwb_kernel(%arg0: i32, %arg1: memref<1x32x128xf32, #tpu.memory_space<vmem>>, %arg2: memref<64x32xf32, #tpu.memory_space<vmem>>, %arg3: memref<256x128xbf16, #tpu.memory_space<vmem>>, %arg4: memref<1x128xf32, #tpu.memory_space<vmem>>, %arg5: memref<1x128xf32, #tpu.memory_space<vmem>>, %arg6: memref<1x128xf32, #tpu.memory_space<vmem>>, %arg7: memref<1x32x128xf32, #tpu.memory_space<vmem>>) attributes {dimension_semantics = [#tpu.dimension_semantics<parallel>], iteration_bounds = array<i64: 2>, scalar_prefetch = 0 : i64, scratch_operands = 0 : i64, tpu.core_type = #tpu.core_type<tc>, window_params = [{transform_indices = @transform_0, window_bounds = array<i64: 1, 32, 128>}, {pipeline_mode = #tpu.pipeline_mode<synchronous>, transform_indices = @transform_1, window_bounds = array<i64: 64, 32>}, {pipeline_mode = #tpu.pipeline_mode<synchronous>, transform_indices = @transform_2, window_bounds = array<i64: 256, 128>}, {pipeline_mode = #tpu.pipeline_mode<synchronous>, transform_indices = @transform_3, window_bounds = array<i64: 1, 128>}, {pipeline_mode = #tpu.pipeline_mode<synchronous>, transform_indices = @transform_4, window_bounds = array<i64: 1, 128>}, {pipeline_mode = #tpu.pipeline_mode<synchronous>, transform_indices = @transform_5, window_bounds = array<i64: 1, 128>}, {transform_indices = @transform_6, window_bounds = array<i64: 1, 32, 128>}]} {
    %c0 = arith.constant 0 : index
    %c0_0 = arith.constant 0 : index
    %0 = vector.load %arg2[%c0, %c0_0] : memref<64x32xf32, #tpu.memory_space<vmem>>, vector<64x32xf32>
    %c0_1 = arith.constant 0 : index
    %c0_2 = arith.constant 0 : index
    %1 = vector.load %arg3[%c0_1, %c0_2] : memref<256x128xbf16, #tpu.memory_space<vmem>>, vector<256x128xbf16>
    %c0_3 = arith.constant 0 : index
    %c0_4 = arith.constant 0 : index
    %2 = vector.load %arg4[%c0_3, %c0_4] : memref<1x128xf32, #tpu.memory_space<vmem>>, vector<1x128xf32>
    %c0_5 = arith.constant 0 : index
    %c0_6 = arith.constant 0 : index
    %3 = vector.load %arg5[%c0_5, %c0_6] : memref<1x128xf32, #tpu.memory_space<vmem>>, vector<1x128xf32>
    %c0_7 = arith.constant 0 : index
    %c0_8 = arith.constant 0 : index
    %4 = vector.load %arg6[%c0_7, %c0_8] : memref<1x128xf32, #tpu.memory_space<vmem>>, vector<1x128xf32>
    %c0_9 = arith.constant 0 : index
    %c0_10 = arith.constant 0 : index
    %c0_11 = arith.constant 0 : index
    %5 = vector.load %arg1[%c0_9, %c0_10, %c0_11] : memref<1x32x128xf32, #tpu.memory_space<vmem>>, vector<1x32x128xf32>
    %6 = vector.shape_cast %5 : vector<1x32x128xf32> to vector<32x128xf32>
    %cst = arith.constant dense<0.000000e+00> : vector<64x128xf32>
    %7 = tpu.matmul %0, %6, %cst {dimension_numbers = #tpu.dot_dimension_numbers<[1], [0], [0], [1], [0, 0, 1, 1], [], []>} : vector<64x32xf32>, vector<32x128xf32>, vector<64x128xf32> -> vector<64x128xf32>
    %8 = vector.extract_strided_slice %7 {offsets = [0, 0], sizes = [32, 128], strides = [1, 1]} : vector<64x128xf32> to vector<32x128xf32>
    %9 = vector.extract_strided_slice %7 {offsets = [32, 0], sizes = [32, 128], strides = [1, 1]} : vector<64x128xf32> to vector<32x128xf32>
    %10 = tpu.concatenate %8, %9 in 1 : vector<32x128xf32>, vector<32x128xf32> -> vector<32x256xf32>
    %11 = arith.truncf %10 : vector<32x256xf32> to vector<32x256xbf16>
    %cst_12 = arith.constant dense<0.000000e+00> : vector<32x128xf32>
    %12 = tpu.matmul %11, %1, %cst_12 {dimension_numbers = #tpu.dot_dimension_numbers<[1], [0], [0], [1], [0, 0, 1, 1], [], []>} : vector<32x256xbf16>, vector<256x128xbf16>, vector<32x128xf32> -> vector<32x128xf32>
    %13 = vector.broadcast %2 : vector<1x128xf32> to vector<32x128xf32>
    %14 = arith.addf %12, %13 : vector<32x128xf32>
    %cst_13 = arith.constant dense<0.000000e+00> : vector<32xf32>
    %15 = vector.multi_reduction <add>, %14, %cst_13 [1] : vector<32x128xf32> to vector<32xf32>
    %16 = vector.shape_cast %15 : vector<32xf32> to vector<32x1xf32>
    %cst_14 = arith.constant 7.812500e-03 : f32
    %17 = vector.broadcast %cst_14 : f32 to vector<32x1xf32>
    %18 = arith.mulf %16, %17 : vector<32x1xf32>
    %19 = vector.broadcast %18 : vector<32x1xf32> to vector<32x128xf32>
    %20 = arith.subf %14, %19 : vector<32x128xf32>
    %21 = arith.mulf %20, %20 : vector<32x128xf32>
    %cst_15 = arith.constant dense<0.000000e+00> : vector<32xf32>
    %22 = vector.multi_reduction <add>, %21, %cst_15 [1] : vector<32x128xf32> to vector<32xf32>
    %23 = vector.shape_cast %22 : vector<32xf32> to vector<32x1xf32>
    %cst_16 = arith.constant 7.812500e-03 : f32
    %24 = vector.broadcast %cst_16 : f32 to vector<32x1xf32>
    %25 = arith.mulf %23, %24 : vector<32x1xf32>
    %cst_17 = arith.constant 9.99999974E-6 : f32
    %26 = vector.broadcast %cst_17 : f32 to vector<32x1xf32>
    %27 = arith.addf %25, %26 : vector<32x1xf32>
    %28 = math.rsqrt %27 : vector<32x1xf32>
    %29 = vector.broadcast %28 : vector<32x1xf32> to vector<32x128xf32>
    %30 = arith.mulf %20, %29 : vector<32x128xf32>
    %31 = vector.broadcast %3 : vector<1x128xf32> to vector<32x128xf32>
    %32 = arith.mulf %30, %31 : vector<32x128xf32>
    %33 = vector.broadcast %4 : vector<1x128xf32> to vector<32x128xf32>
    %34 = arith.addf %32, %33 : vector<32x128xf32>
    %c0_18 = arith.constant 0 : index
    %c0_19 = arith.constant 0 : index
    %c0_20 = arith.constant 0 : index
    %35 = vector.load %arg7[%c0_18, %c0_19, %c0_20] : memref<1x32x128xf32, #tpu.memory_space<vmem>>, vector<1x32x128xf32>
    %36 = vector.shape_cast %35 : vector<1x32x128xf32> to vector<32x128xf32>
    %37 = vector.shape_cast %34 : vector<32x128xf32> to vector<1x32x128xf32>
    tpu.vector_store %arg7[%c0_18, %c0_19, %c0_20], %37 {strides = array<i32>} : memref<1x32x128xf32, #tpu.memory_space<vmem>>, vector<1x32x128xf32>,
    return
  }
  func.func @transform_0(%arg0: i32) -> (i32, i32, i32) {
    %c0_i32 = arith.constant 0 : i32
    %c0_i32_0 = arith.constant 0 : i32
    %c0_i32_1 = arith.constant 0 : i32
    return %arg0, %c0_i32, %c0_i32_0 : i32, i32, i32
  }
  func.func @transform_1(%arg0: i32) -> (i32, i32) {
    %c0_i32 = arith.constant 0 : i32
    %c0_i32_0 = arith.constant 0 : i32
    %c0_i32_1 = arith.constant 0 : i32
    return %c0_i32, %c0_i32_0 : i32, i32
  }
  func.func @transform_2(%arg0: i32) -> (i32, i32) {
    %c0_i32 = arith.constant 0 : i32
    %c0_i32_0 = arith.constant 0 : i32
    %c0_i32_1 = arith.constant 0 : i32
    return %c0_i32, %c0_i32_0 : i32, i32
  }
  func.func @transform_3(%arg0: i32) -> (i32, i32) {
    %c0_i32 = arith.constant 0 : i32
    %c0_i32_0 = arith.constant 0 : i32
    %c0_i32_1 = arith.constant 0 : i32
    return %c0_i32, %c0_i32_0 : i32, i32
  }
  func.func @transform_4(%arg0: i32) -> (i32, i32) {
    %c0_i32 = arith.constant 0 : i32
    %c0_i32_0 = arith.constant 0 : i32
    %c0_i32_1 = arith.constant 0 : i32
    return %c0_i32, %c0_i32_0 : i32, i32
  }
  func.func @transform_5(%arg0: i32) -> (i32, i32) {
    %c0_i32 = arith.constant 0 : i32
    %c0_i32_0 = arith.constant 0 : i32
    %c0_i32_1 = arith.constant 0 : i32
    return %c0_i32, %c0_i32_0 : i32, i32
  }
  func.func @transform_6(%arg0: i32) -> (i32, i32, i32) {
    %c0_i32 = arith.constant 0 : i32
    %c0_i32_0 = arith.constant 0 : i32
    %c0_i32_1 = arith.constant 0 : i32
    return %arg0, %c0_i32, %c0_i32_0 : i32, i32, i32
  }
}

</mosaic_0001>

<bundles_post_ra>
// kernel: tpu_custom_call.1
= control target key start
LH: loop header
LB: loop body
LE: loop exit
PB: predicated region body
PF: predicated region fallthrough
CT: control target
= control target key end

     0   :  { %11 = vsyncpa [#allocation3], 0  ;;  %s1263_s0 = inlined_call_operand.vmem [shape: f32[2,32,128], index: 0, kind: input, shape index: {}]   ;;  %s1264_s1 = inlined_call_operand.vmem [shape: f32[64,32], index: 1, kind: input, shape index: {}]   ;;  %s1265_s2 = inlined_call_operand.hbm [shape: bf16[256,128], index: 2, kind: input, shape index: {}]   ;;  %s1266_s3 = inlined_call_operand.vmem [shape: f32[1,128], index: 3, kind: input, shape index: {}]   ;;  %s1267_s4 = inlined_call_operand.vmem [shape: f32[1,128], index: 4, kind: input, shape index: {}]   ;;  %s1268_s5 = inlined_call_operand.vmem [shape: f32[1,128], index: 5, kind: input, shape index: {}]   ;;  %s1269_s6 = inlined_call_operand.hbm [shape: f32[2,32,128], index: 6, kind: output, shape index: {}]  }
   0x1   :  { %12 = vsyncpa [#allocation4], 0 }
   0x2   :  { %14 = vsyncpa [#allocation4 + $0x1], 0  ;;  %s1080_s21 = smov 0   ;;  %s1082_s22 = smov 0  }
   0x3   :  { %s1084_s23 = smov 0   ;;  %s1086_s24 = smov 0  }
   0x4 LB: > { %s1101_s25 = sadd.s32 4294967295, %s1037_s24   ;;  %s754_s26 = sadd.s32 4294967294, %s1037_s24   ;;  %s1037_s24 = sphi %s1086_s24, %s1285_s24   ;;  %s1033_s23 = sphi %s1084_s23, %s1284_s23   ;;  %s1029_s22 = sphi %s1082_s22, %s1283_s22   ;;  %s1025_s21 = sphi %s1080_s21, %s1282_s21  }
   0x5   : > { %s1105_s27 = sadd.s32 1, %s1037_s24   ;;  %s158_s28 = sadd.s32 1, %s1033_s23 }
   0x6   : > { %s155_s29 = ssub.s32 %s1037_s24, %s1105_s27  ;;  %p168_p0 = scmp.ne.s32.totalorder %s1033_s23, %s1029_s22 }
   0x7   : > { %p156_p1 = scmp.eq.s32.totalorder %s155_s29, 0  ;;  %p169_p2 = scmp.eq.s32.totalorder %s1101_s25, 1 }
   0x8   : > { %p174_p3 = scmp.ne.s32.totalorder %s1029_s22, %s1025_s21  ;;  %p175_p4 = scmp.eq.s32.totalorder %s754_s26, 1 }
   0x9   : > { %s1116_s30 = scalar_select %p156_p1, %s1033_s23, %s158_s28  }
   0xa   : > { %p1118_p5 = por %p169_p2, %p168_p0  ;;  %p1122_p6 = por %p175_p4, %p174_p3 }
   0xb   : > { %p755_p7 = scmp.ge.s32.totalorder %s1037_s24, 1  ;;  %p182_p8 = scmp.lt.s32.totalorder %s1037_s24, 3 }
   0xc   : > { %s1273_s7 = scalar_select %p1118_p5, 1, 0 }
   0xd   : > { %s1274_s8 = scalar_select %p1122_p6, 1, 0 }
   0xe   : > { %p1270_p9 = scmp.eq.s32.totalorder %s1101_s25, 0  ;;  %p1129_p10 = pnand %p755_p7, %p182_p8 }
   0xf   : > { %s1039_s10 = smov [#allocation2]   ;;  %s943_s15 = scalar_lea.hbm %s1265_s2, 2048 }
  0x10   : > { %s1275_s9 = scalar_select %p1129_p10, 1, 0 }
  0x11   : > { %s197_s11 = sshll.u32 %s1039_s10, 4  ;;  %p871_p11 = pneg %p1129_p10  ;;  %s198_s11 = int_to_ptr.vmem [resolvable:$true] %s197_s11 }
  0x12   : > { %p944_p13 = scmp.ne.s32.totalorder %s1265_s2, %s943_s15  ;;  %p950_p3 = scmp.lt.u32.totalorder %s943_s15, %s1265_s2 }
  0x13   : > { %p1137_p12 = pnand %p1270_p9, %p871_p11 }
  0x15   : > { %p945_p0 = pneg %p1137_p12 }
  0x17   : > { %p946_p1 = pnand %p945_p0, %p944_p13 }
  0x19   : > { %p947_p2 = pneg %p946_p1 }
  0x1b   : > { %p952_p4 = pnand %p950_p3, %p947_p2 }
  0x1d   : > { %955 = shalt.err (!%p952_p4)
}
  0x1e   : > { %s956_s20 = scalar_lea.vmem %s198_s11, 2048  ;;  %p964_p9 = scmp.lt.s32.totalorder %s198_s11, %s198_s11 }
  0x1f   : > { %p957_p7 = scmp.ne.s32.totalorder %s198_s11, %s956_s20  ;;  %p965_p6 = scmp.lt.s32.totalorder %s956_s20, %s956_s20 }
  0x21   : > { %p959_p8 = pnand %p957_p7, %p945_p0  ;;  %p966_p5 = por %p965_p6, %p964_p9 }
  0x23   : > { %p960_p11 = pneg %p959_p8 }
  0x25   : > { %p967_p10 = pnand %p966_p5, %p960_p11 }
  0x27   : > { %970 = shalt.err (!%p967_p10)
}
  0x28   : > { %s1040_s26 = smov 64   ;;  %s1041_s28 = smov 4  }
  0x29   : > { %874 = dma.hbm_to_vmem [thread:$0]  (!%p1137_p12), %s1265_s2, 2048, %s198_s11, [#allocation3], %s1040_s26, %s1040_s26, %s1041_s28  }
  0x2a   : > { %p1277_p13 = scmp.ne.s32.totalorder %s1275_s9, 0 }
  0x2b   : > { %p1278_p1 = scmp.eq.s32.totalorder (!%p1277_p13), %s1101_s25, 0 }
  0x2c   : > { %230 = sbr.rel (%p1277_p13) target bundleno = 848 (0x350), region = 44 }
  0x33   : > { %1016 = dma.done.wait (%p1278_p1), [#allocation3], 2048   ;;  %p1279_p0 = pmov %p1278_p1 }
  0x34   : > { %p260_p5 = scmp.lt.s32.totalorder %s1101_s25, 1  ;;  %vm313_vm0 = vcmask 261120   ;;  %v266_v5 = vld [vmem:[%s1264_s1] sm:$0xff]  ;;  %v267_v9 = vld [vmem:[%s1264_s1 + $0x8] sm:$0xff]  ;;  %v923_v12 = vld [vmem:[#allocation2 + $0x50] sm:$0xff]   ;;  %s257_s18 = sand.u32 1, %s1029_s22  }
  0x35   : > { %1018 = vsyncadd (%p1279_p0), [#allocation3], 4294965248  ;;  %845 = vmatprep.mubr.msk.f32.mxu0 %vm313_vm0, %v266_v5  ;;  %v919_v7 = vld [vmem:[#allocation2 + $0x40] sm:$0xff]   ;;  %v921_v10 = vld [vmem:[#allocation2 + $0x48] sm:$0xff]   ;;  %s760_s26 = sshll.u32 %s257_s18, 5  ;;  %s1222_s9 = scalar_lea.sflag [#allocation4], %s257_s18 }
  0x36   : > { %s261_s13 = scalar_select %p260_p5, %s1101_s25, 1  ;;  %v920_v8 = vld [vmem:[#allocation2] sm:$0xff]   ;;  %809 = vmatprep.subr.bf16.mxu1 %v919_v7  ;;  %v922_v11 = vld [vmem:[#allocation2 + $0x8] sm:$0xff]   ;;  %v268_v13 = vld [vmem:[%s1264_s1 + $0x10] sm:$0xff] }
  0x37   : > { %810 = vmatpush3.bf16.msra.mxu1 %v920_v8  ;;  %v269_v14 = vld [vmem:[%s1264_s1 + $0x18] sm:$0xff]  ;;  %v270_v15 = vld [vmem:[%s1264_s1 + $0x20] sm:$0xff]  ;;  %v924_v16 = vld [vmem:[#allocation2 + $0x10] sm:$0xff]   ;;  %s259_s10 = scalar_lea.vmem [#allocation5], %s760_s26  ;;  %p1280_p9 = scmp.ne.s32.totalorder %s1273_s7, 0 }
  0x38   : > { %s795_s14 = sshll.u32 %s261_s13, 5  ;;  %811 = vmatprep.subr.bf16.mxu1 %v921_v10  ;;  %v925_v17 = vld [vmem:[#allocation2 + $0x58] sm:$0xff]   ;;  %v271_v19 = vld [vmem:[%s1264_s1 + $0x28] sm:$0xff]  ;;  %v927_v20 = vld [vmem:[#allocation2 + $0x60] sm:$0xff]   ;;  %s796_s13 = sshll.u32 %s1101_s25, 9 }
  0x39   : > { %s264_s16 = scalar_lea.vmem %s1263_s0, %s795_s14  ;;  %v926_v18 = vld [vmem:[#allocation2 + $0x18] sm:$0xff]   ;;  %v272_v21 = vld [vmem:[%s1264_s1 + $0x30] sm:$0xff]  ;;  %v928_v22 = vld [vmem:[#allocation2 + $0x20] sm:$0xff]   ;;  %s680_s14 = sshll.u32 %s259_s10, 4  ;;  %s1218_s14 = int_to_ptr.vmem [resolvable:$true] %s680_s14 }
  0x3a   : > { %v309_v0 = vld [vmem:[%s264_s16] sm:$0xff]  ;;  %v310_v1 = vld [vmem:[%s264_s16 + $0x8] sm:$0xff]  ;;  %v311_v2 = vld [vmem:[%s264_s16 + $0x10] sm:$0xff]  ;;  %s971_s11 = scalar_lea.vmem %s1218_s14, 512  ;;  %s1042_s25 = smov [#allocation5]  }
  0x3b   : > { %v857_v3 = vpack.c.bf16 %v310_v1, %v309_v0  ;;  %v312_v4 = vld [vmem:[%s264_s16 + $0x18] sm:$0xff]  ;;  %812 = vmatpush3.bf16.msra.mxu1 %v922_v11  ;;  %v929_v24 = vld [vmem:[#allocation2 + $0x68] sm:$0xff]   ;;  %v931_v26 = vld [vmem:[#allocation2 + $0x70] sm:$0xff]   ;;  %s1216_s16 = scalar_lea.hbm %s1269_s6, %s796_s13  ;;  %p972_p6 = scmp.ne.s32.totalorder %s1218_s14, %s971_s11 }
  0x3c   : > { %v861_v6 = vpack.c.bf16 %v312_v4, %v311_v2  ;;  %813 = vmatprep.subr.bf16.mxu1 %v923_v12  ;;  %v273_v23 = vld [vmem:[%s1264_s1 + $0x38] sm:$0xff]  ;;  %v930_v25 = vld [vmem:[#allocation2 + $0x28] sm:$0xff]   ;;  %v932_v27 = vld [vmem:[#allocation2 + $0x30] sm:$0xff]   ;;  %s975_s17 = sshll.u32 %s1042_s25, 4  ;;  %s976_s17 = int_to_ptr.vmem [resolvable:$false] %s975_s17 }
  0x3d   : > { %858 = vmatprep.subr.bf16.mxu0 %v857_v3  ;;  %v933_v28 = vld [vmem:[#allocation2 + $0x78] sm:$0xff]   ;;  %v771_v44 = vld [vmem:[%s1266_s3] ss:$0 sm:$0xff]  ;;  %p973_p10 = pnand %p972_p6, %p1280_p9  ;;  %s977_s19 = scalar_lea.vmem %s976_s17, 1024 }
  0x3e   : > { %860 = vmatpush3.bf16.msra.mxu0 %v857_v3  ;;  %v934_v29 = vld [vmem:[#allocation2 + $0x38] sm:$0xff]   ;;  %p978_p2 = scmp.lt.s32.totalorder %s1218_s14, %s976_s17  ;;  %p979_p3 = scmp.lt.s32.totalorder %s977_s19, %s971_s11 }
  0x3f   : > { %862 = vmatprep.subr.bf16.mxu0 %v861_v6  ;;  %814 = vmatpush3.bf16.msra.mxu1 %v924_v16  ;;  %p974_p12 = pneg %p973_p10 }
  0x40   : > { %815 = vmatprep.subr.bf16.mxu1 %v925_v17  ;;  %p980_p4 = por %p979_p3, %p978_p2 }
  0x42   : > { %864 = vmatpush3.bf16.msra.mxu0 %v861_v6  ;;  %p981_p7 = pnand %p980_p4, %p974_p12 }
  0x43   : > { %816 = vmatpush3.bf16.msra.mxu1 %v926_v18 }
  0x44   : > { %817 = vmatprep.subr.bf16.mxu1 %v927_v20 }
  0x45   : > { %846 = vmatmul.mubr.msk.f32.vlgmr.msra.gmra.mrb[0].mxu0 %vm313_vm0, %v267_v9 }
  0x46   : > { %848 = vmatprep.mubr.msk.f32.mxu0 %vm313_vm0, %v268_v13 }
  0x47   : > { %818 = vmatpush3.bf16.msra.mxu1 %v928_v22 }
  0x48   : > { %819 = vmatprep.subr.bf16.mxu1 %v929_v24 }
  0x49   : > { %849 = vmatmul.mubr.msk.f32.gmra.mrb[2].mxu0 %vm313_vm0, %v269_v14 }
  0x4a   : > { %851 = vmatprep.mubr.msk.f32.mxu0 %vm313_vm0, %v270_v15 }
  0x4b   : > { %820 = vmatpush3.bf16.msra.mxu1 %v930_v25 }
  0x4c   : > { %821 = vmatprep.subr.bf16.mxu1 %v931_v26  ;;  %v789_v26 = vld [vmem:[%s1268_s5] ss:$0 sm:$0xff] }
  0x4d   : > { %852 = vmatmul.mubr.msk.f32.gmra.mrb[4].mxu0 %vm313_vm0, %v271_v19 }
  0x4e   : > { %854 = vmatprep.mubr.msk.f32.mxu0 %vm313_vm0, %v272_v21 }
  0x4f   : > { %822 = vmatpush3.bf16.msra.mxu1 %v932_v27 }
  0x50   : > { %823 = vmatprep.subr.bf16.mxu1 %v933_v28 }
  0x51   : > { %855 = vmatmul.mubr.msk.f32.gmra.mrb[6].mxu0 %vm313_vm0, %v273_v23  ;;  %v788_v23 = vld [vmem:[%s1267_s4] ss:$0 sm:$0xff] }
  0x53   : > { %824 = vmatpush3.bf16.msra.mxu1 %v934_v29 }
 0x118   : > { %v847_v30 = vpop.f32.mrb[0].mxu0 }
 0x119   : > { %v404_v31 = vpop.f32.mrb[1].mxu0 }
 0x11a   : > { %v443_v32 = vpack.c.bf16 %v847_v30, %v404_v31 }
 0x11c   : > { %v850_v33 = vpop.f32.mrb[2].mxu0 }
 0x11d   : > { %v414_v34 = vpop.f32.mrb[3].mxu0 }
 0x11e   : > { %v445_v35 = vpack.c.bf16 %v850_v33, %v414_v34 }
 0x120   : > { %v853_v36 = vpop.f32.mrb[4].mxu0 }
 0x121   : > { %v424_v37 = vpop.f32.mrb[5].mxu0 }
 0x122   : > { %v444_v38 = vpack.c.bf16 %v853_v36, %v424_v37 }
 0x124   : > { %581 = vmatprep.mubr.bf16.mxu1 %v444_v38  ;;  %v856_v39 = vpop.f32.mrb[6].mxu0 }
 0x125   : > { %582 = vmatmul.mubr.bf16.vlgmr.msra.gmra.mrb[0].mxu1 %v443_v32  ;;  %v434_v40 = vpop.f32.mrb[7].mxu0 }
 0x126   : > { %v446_v41 = vpack.c.bf16 %v856_v39, %v434_v40 }
 0x128   : > { %589 = vmatprep.mubr.bf16.mxu1 %v446_v41 }
 0x12d   : > { %590 = vmatmul.mubr.bf16.gmra.mrb[4].mxu1 %v445_v35 }
 0x1f8   : > { %v825_v42 = vpop.f32.mrb[0].mxu1 }
 0x1f9   : > { %v826_v43 = vpop.f32.mrb[1].mxu1 }
 0x1fa   : > { %v827_v45 = vadd.f32 %v826_v43, %v825_v42  ;;  %v828_v46 = vpop.f32.mrb[2].mxu1 }
 0x1fb   : > { %v829_v47 = vpop.f32.mrb[3].mxu1 }
 0x1fc   : > { %v830_v48 = vadd.f32 %v829_v47, %v828_v46  ;;  %v584_v49 = vadd.f32 %v827_v45, %v771_v44 }
 0x1fe   : > { %598 = vadd.xlane.f32.xlu0 %v584_v49  ;;  %v587_v51 = vadd.f32 %v830_v48, %v771_v44 }
 0x200   : > { %v831_v50 = vpop.f32.mrb[4].mxu1 }
 0x201   : > { %v832_v52 = vpop.f32.mrb[5].mxu1 }
 0x202   : > { %v833_v53 = vadd.f32 %v832_v52, %v831_v50  ;;  %600 = vadd.xlane.f32.xlu0 %v587_v51  ;;  %v834_v54 = vpop.f32.mrb[6].mxu1 }
 0x203   : > { %v835_v55 = vpop.f32.mrb[7].mxu1 }
 0x204   : > { %v836_v56 = vadd.f32 %v835_v55, %v834_v54  ;;  %v592_v57 = vadd.f32 %v833_v53, %v771_v44 }
 0x206   : > { %602 = vadd.xlane.f32.xlu1 %v592_v57  ;;  %v595_v58 = vadd.f32 %v836_v56, %v771_v44 }
 0x20a   : > { %604 = vadd.xlane.f32.xlu1 %v595_v58 }
 0x28b   : > { %v599_v59 = vpop.xlane.xlu0 %598 }
 0x28c   : > { %v606_v60 = vmul.f32 0.0078125, %v599_v59 }
 0x28e   : > { %v610_v61 = vsub.f32 %v584_v49, %v606_v60 }
 0x28f   : > { %v601_v62 = vpop.xlane.xlu0 %600 }
 0x290   : > { %v607_v63 = vmul.f32 0.0078125, %v601_v62  ;;  %v614_v0 = vmul.f32 %v610_v61, %v610_v61 }
 0x292   : > { %v611_v1 = vsub.f32 %v587_v51, %v607_v63  ;;  %618 = vadd.xlane.f32.xlu0 %v614_v0 }
 0x293   : > { %v603_v2 = vpop.xlane.xlu1 %602 }
 0x294   : > { %v608_v3 = vmul.f32 0.0078125, %v603_v2  ;;  %v615_v4 = vmul.f32 %v611_v1, %v611_v1 }
 0x296   : > { %v612_v5 = vsub.f32 %v592_v57, %v608_v3  ;;  %620 = vadd.xlane.f32.xlu1 %v615_v4 }
 0x297   : > { %v605_v6 = vpop.xlane.xlu1 %604 }
 0x298   : > { %v609_v7 = vmul.f32 0.0078125, %v605_v6  ;;  %v616_v8 = vmul.f32 %v612_v5, %v612_v5 }
 0x29a   : > { %v613_v9 = vsub.f32 %v595_v58, %v609_v7  ;;  %622 = vadd.xlane.f32.xlu0 %v616_v8 }
 0x29c   : > { %v617_v10 = vmul.f32 %v613_v9, %v613_v9 }
 0x29e   : > { %624 = vadd.xlane.f32.xlu1 %v617_v10 }
 0x31f   : > { %v619_v11 = vpop.xlane.xlu0 %618 }
 0x320   : > { %v626_v12 = vmul.f32 0.0078125, %v619_v11 }
 0x322   : > { %v630_v13 = vadd.f32 1e-05, %v626_v12 }
 0x323   : > { %v621_v14 = vpop.xlane.xlu1 %620 }
 0x324   : > { %935 = vrsqrt.f32 %v630_v13  ;;  %v627_v15 = vmul.f32 0.0078125, %v621_v14 }
 0x326   : > { %v631_v16 = vadd.f32 1e-05, %v627_v15 }
 0x327   : > { %v623_v17 = vpop.xlane.xlu0 %622 }
 0x328   : > { %937 = vrsqrt.f32 %v631_v16  ;;  %v628_v18 = vmul.f32 0.0078125, %v623_v17 }
 0x32a   : > { %v632_v19 = vadd.f32 1e-05, %v628_v18 }
 0x32b   : > { %v625_v20 = vpop.xlane.xlu1 %624 }
 0x32c   : > { %939 = vrsqrt.f32 %v632_v19  ;;  %v629_v21 = vmul.f32 0.0078125, %v625_v20 }
 0x32e   : > { %v936_v22 = vpop.eup %935  ;;  %v633_v24 = vadd.f32 1e-05, %v629_v21 }
 0x32f   : > { %v638_v25 = vmul.f32 %v936_v22, %v610_v61 }
 0x330   : > { %941 = vrsqrt.f32 %v633_v24 }
 0x331   : > { %v648_v27 = vmul.f32 %v788_v23, %v638_v25 }
 0x332   : > { %v938_v28 = vpop.eup %937 }
 0x333   : > { %v658_v29 = vadd.f32 %v789_v26, %v648_v27  ;;  %v639_v30 = vmul.f32 %v938_v28, %v611_v1 }
 0x335   : > { %662 = vst [vmem:[%s259_s10] sm:$0xff] %v658_v29  ;;  %v649_v31 = vmul.f32 %v788_v23, %v639_v30 }
 0x336   : > { %v940_v32 = vpop.eup %939 }
 0x337   : > { %v659_v33 = vadd.f32 %v789_v26, %v649_v31  ;;  %v640_v34 = vmul.f32 %v940_v32, %v612_v5 }
 0x339   : > { %663 = vst [vmem:[%s259_s10 + $0x8] sm:$0xff] %v659_v33  ;;  %v650_v35 = vmul.f32 %v788_v23, %v640_v34 }
 0x33a   : > { %v942_v36 = vpop.eup %941 }
 0x33b   : > { %v660_v37 = vadd.f32 %v789_v26, %v650_v35  ;;  %v641_v38 = vmul.f32 %v942_v36, %v613_v9 }
 0x33d   : > { %664 = vst [vmem:[%s259_s10 + $0x10] sm:$0xff] %v660_v37  ;;  %v651_v39 = vmul.f32 %v788_v23, %v641_v38 }
 0x33f   : > { %v661_v40 = vadd.f32 %v789_v26, %v651_v39 }
 0x341   : > { %665 = vst [vmem:[%s259_s10 + $0x18] sm:$0xff] %v661_v40 }
 0x342   : > { %984 = shalt.err (!%p981_p7)
}
 0x343   : > { %s985_s18 = scalar_lea.hbm %s1216_s16, 512  ;;  %s989_s28 = scalar_lea.hbm %s1269_s6, 1024 }
 0x344   : > { %p986_p8 = scmp.ne.s32.totalorder %s1216_s16, %s985_s18  ;;  %p990_p1 = scmp.lt.u32.totalorder %s1216_s16, %s1269_s6 }
 0x345   : > { %p991_p0 = scmp.lt.u32.totalorder %s989_s28, %s985_s18  ;;  %p993_p6 = scmp.lt.u32.totalorder %s985_s18, %s1216_s16 }
 0x346   : > { %p987_p11 = pnand %p986_p8, %p1280_p9 }
 0x347   : > { %p992_p5 = por %p991_p0, %p990_p1 }
 0x348   : > { %p988_p13 = pneg %p987_p11 }
 0x349   : > { %p994_p10 = por %p993_p6, %p992_p5 }
 0x34b   : > { %p995_p12 = pnand %p994_p10, %p988_p13 }
 0x34d   : > { %998 = shalt.err (!%p995_p12)
}
 0x34e   : > { %s1043_s13 = smov 128   ;;  %s1044_s15 = smov 8  }
 0x34f   : > { %869 = dma.vmem_to_hbm [thread:$0]  (%p1280_p9), %s1218_s14, 512, %s1216_s16, %s1222_s9, %s1043_s13, %s1043_s13, %s1044_s15  }
 0x350 PF: > { %p881_p2 = scmp.ge.s32.totalorder %s1037_s24, 2  ;;  %s695_s12 = sand.u32 1, %s1025_s21  }
 0x351   : > { %p1281_p3 = scmp.ne.s32.totalorder %s1274_s8, 0  ;;  %s696_s11 = scalar_lea.sflag [#allocation4], %s695_s12 }
 0x353   : > { %p876_p4 = pnand %p881_p2, %p1281_p3 }
 0x355   : > { %1020 = dma.done.wait (!%p876_p4), %s696_s11, 512  }
 0x356   : > { %1022 = vsyncadd (!%p876_p4), %s696_s11, 4294966784  ;;  %p17_p7 = scmp.ge.s32.totalorder %s1105_s27, 4   ;;  %s1282_s21 = smov %s1029_s22 }
 0x357   : > { %s1283_s22 = smov %s1033_s23  ;;  %s1284_s23 = smov %s1116_s30 }
 0x358   : > { %s1285_s24 = smov %s1105_s27  ;;  %19 = sbr.rel (!%p17_p7) target bundleno = 4 (0x4), region = 84 }
 0x35f   :  { %701 = vsyncpa [#allocation3], 1 }
 0x360   :  { %703 = vsyncpa [#allocation3 + $0x1], 1 }
 0x361   :  { %704 = vsyncpa [#allocation4], 1 }
 0x362   :  { %706 = vsyncpa [#allocation4 + $0x1], 1 }

// kernel: tpu_custom_call.1
= control target key start
LH: loop header
LB: loop body
LE: loop exit
PB: predicated region body
PF: predicated region fallthrough
CT: control target
= control target key end

     0   :  { %11 = vsyncpa [#allocation3], 0  ;;  %s1263_s0 = inlined_call_operand.vmem [shape: f32[2,32,128], index: 0, kind: input, shape index: {}]   ;;  %s1264_s1 = inlined_call_operand.vmem [shape: f32[64,32], index: 1, kind: input, shape index: {}]   ;;  %s1265_s2 = inlined_call_operand.hbm [shape: bf16[256,128], index: 2, kind: input, shape index: {}]   ;;  %s1266_s3 = inlined_call_operand.vmem [shape: f32[1,128], index: 3, kind: input, shape index: {}]   ;;  %s1267_s4 = inlined_call_operand.vmem [shape: f32[1,128], index: 4, kind: input, shape index: {}]   ;;  %s1268_s5 = inlined_call_operand.vmem [shape: f32[1,128], index: 5, kind: input, shape index: {}]   ;;  %s1269_s6 = inlined_call_operand.hbm [shape: f32[2,32,128], index: 6, kind: output, shape index: {}]  }
   0x1   :  { %12 = vsyncpa [#allocation4], 0 }
   0x2   :  { %14 = vsyncpa [#allocation4 + $0x1], 0  ;;  %s1080_s21 = smov 0   ;;  %s1082_s22 = smov 0  }
   0x3   :  { %s1084_s23 = smov 0   ;;  %s1086_s24 = smov 0  }
   0x4 LB: > { %s1101_s25 = sadd.s32 4294967295, %s1037_s24   ;;  %s754_s26 = sadd.s32 4294967294, %s1037_s24   ;;  %s1037_s24 = sphi %s1086_s24, %s1285_s24   ;;  %s1033_s23 = sphi %s1084_s23, %s1284_s23   ;;  %s1029_s22 = sphi %s1082_s22, %s1283_s22   ;;  %s1025_s21 = sphi %s1080_s21, %s1282_s21  }
   0x5   : > { %s1105_s27 = sadd.s32 1, %s1037_s24   ;;  %s158_s28 = sadd.s32 1, %s1033_s23 }
   0x6   : > { %s155_s29 = ssub.s32 %s1037_s24, %s1105_s27  ;;  %p168_p0 = scmp.ne.s32.totalorder %s1033_s23, %s1029_s22 }
   0x7   : > { %p156_p1 = scmp.eq.s32.totalorder %s155_s29, 0  ;;  %p169_p2 = scmp.eq.s32.totalorder %s1101_s25, 1 }
   0x8   : > { %p174_p3 = scmp.ne.s32.totalorder %s1029_s22, %s1025_s21  ;;  %p175_p4 = scmp.eq.s32.totalorder %s754_s26, 1 }
   0x9   : > { %s1116_s30 = scalar_select %p156_p1, %s1033_s23, %s158_s28  }
   0xa   : > { %p1118_p5 = por %p169_p2, %p168_p0  ;;  %p1122_p6 = por %p175_p4, %p174_p3 }
   0xb   : > { %p755_p7 = scmp.ge.s32.totalorder %s1037_s24, 1  ;;  %p182_p8 = scmp.lt.s32.totalorder %s1037_s24, 3 }
   0xc   : > { %s1273_s7 = scalar_select %p1118_p5, 1, 0 }
   0xd   : > { %s1274_s8 = scalar_select %p1122_p6, 1, 0 }
   0xe   : > { %p1270_p9 = scmp.eq.s32.totalorder %s1101_s25, 0  ;;  %p1129_p10 = pnand %p755_p7, %p182_p8 }
   0xf   : > { %s1039_s10 = smov [#allocation2]   ;;  %s943_s15 = scalar_lea.hbm %s1265_s2, 2048 }
  0x10   : > { %s1275_s9 = scalar_select %p1129_p10, 1, 0 }
  0x11   : > { %s197_s11 = sshll.u32 %s1039_s10, 4  ;;  %p871_p11 = pneg %p1129_p10  ;;  %s198_s11 = int_to_ptr.vmem [resolvable:$true] %s197_s11 }
  0x12   : > { %p944_p13 = scmp.ne.s32.totalorder %s1265_s2, %s943_s15  ;;  %p950_p3 = scmp.lt.u32.totalorder %s943_s15, %s1265_s2 }
  0x13   : > { %p1137_p12 = pnand %p1270_p9, %p871_p11 }
  0x15   : > { %p945_p0 = pneg %p1137_p12 }
  0x17   : > { %p946_p1 = pnand %p945_p0, %p944_p13 }
  0x19   : > { %p947_p2 = pneg %p946_p1 }
  0x1b   : > { %p952_p4 = pnand %p950_p3, %p947_p2 }
  0x1d   : > { %955 = shalt.err (!%p952_p4)
}
  0x1e   : > { %s956_s20 = scalar_lea.vmem %s198_s11, 2048  ;;  %p964_p9 = scmp.lt.s32.totalorder %s198_s11, %s198_s11 }
  0x1f   : > { %p957_p7 = scmp.ne.s32.totalorder %s198_s11, %s956_s20  ;;  %p965_p6 = scmp.lt.s32.totalorder %s956_s20, %s956_s20 }
  0x21   : > { %p959_p8 = pnand %p957_p7, %p945_p0  ;;  %p966_p5 = por %p965_p6, %p964_p9 }
  0x23   : > { %p960_p11 = pneg %p959_p8 }
  0x25   : > { %p967_p10 = pnand %p966_p5, %p960_p11 }
  0x27   : > { %970 = shalt.err (!%p967_p10)
}
  0x28   : > { %s1040_s26 = smov 64   ;;  %s1041_s28 = smov 4  }
  0x29   : > { %874 = dma.hbm_to_vmem [thread:$0]  (!%p1137_p12), %s1265_s2, 2048, %s198_s11, [#allocation3], %s1040_s26, %s1040_s26, %s1041_s28  }
  0x2a   : > { %p1277_p13 = scmp.ne.s32.totalorder %s1275_s9, 0 }
  0x2b   : > { %p1278_p1 = scmp.eq.s32.totalorder (!%p1277_p13), %s1101_s25, 0 }
  0x2c   : > { %230 = sbr.rel (%p1277_p13) target bundleno = 848 (0x350), region = 44 }
  0x33   : > { %1016 = dma.done.wait (%p1278_p1), [#allocation3], 2048   ;;  %p1279_p0 = pmov %p1278_p1 }
  0x34   : > { %p260_p5 = scmp.lt.s32.totalorder %s1101_s25, 1  ;;  %vm313_vm0 = vcmask 261120   ;;  %v266_v5 = vld [vmem:[%s1264_s1] sm:$0xff]  ;;  %v267_v9 = vld [vmem:[%s1264_s1 + $0x8] sm:$0xff]  ;;  %v923_v12 = vld [vmem:[#allocation2 + $0x50] sm:$0xff]   ;;  %s257_s18 = sand.u32 1, %s1029_s22  }
  0x35   : > { %1018 = vsyncadd (%p1279_p0), [#allocation3], 4294965248  ;;  %845 = vmatprep.mubr.msk.f32.mxu0 %vm313_vm0, %v266_v5  ;;  %v919_v7 = vld [vmem:[#allocation2 + $0x40] sm:$0xff]   ;;  %v921_v10 = vld [vmem:[#allocation2 + $0x48] sm:$0xff]   ;;  %s760_s26 = sshll.u32 %s257_s18, 5  ;;  %s1222_s9 = scalar_lea.sflag [#allocation4], %s257_s18 }
  0x36   : > { %s261_s13 = scalar_select %p260_p5, %s1101_s25, 1  ;;  %v920_v8 = vld [vmem:[#allocation2] sm:$0xff]   ;;  %809 = vmatprep.subr.bf16.mxu1 %v919_v7  ;;  %v922_v11 = vld [vmem:[#allocation2 + $0x8] sm:$0xff]   ;;  %v268_v13 = vld [vmem:[%s1264_s1 + $0x10] sm:$0xff] }
  0x37   : > { %810 = vmatpush3.bf16.msra.mxu1 %v920_v8  ;;  %v269_v14 = vld [vmem:[%s1264_s1 + $0x18] sm:$0xff]  ;;  %v270_v15 = vld [vmem:[%s1264_s1 + $0x20] sm:$0xff]  ;;  %v924_v16 = vld [vmem:[#allocation2 + $0x10] sm:$0xff]   ;;  %s259_s10 = scalar_lea.vmem [#allocation5], %s760_s26  ;;  %p1280_p9 = scmp.ne.s32.totalorder %s1273_s7, 0 }
  0x38   : > { %s795_s14 = sshll.u32 %s261_s13, 5  ;;  %811 = vmatprep.subr.bf16.mxu1 %v921_v10  ;;  %v925_v17 = vld [vmem:[#allocation2 + $0x58] sm:$0xff]   ;;  %v271_v19 = vld [vmem:[%s1264_s1 + $0x28] sm:$0xff]  ;;  %v927_v20 = vld [vmem:[#allocation2 + $0x60] sm:$0xff]   ;;  %s796_s13 = sshll.u32 %s1101_s25, 9 }
  0x39   : > { %s264_s16 = scalar_lea.vmem %s1263_s0, %s795_s14  ;;  %v926_v18 = vld [vmem:[#allocation2 + $0x18] sm:$0xff]   ;;  %v272_v21 = vld [vmem:[%s1264_s1 + $0x30] sm:$0xff]  ;;  %v928_v22 = vld [vmem:[#allocation2 + $0x20] sm:$0xff]   ;;  %s680_s14 = sshll.u32 %s259_s10, 4  ;;  %s1218_s14 = int_to_ptr.vmem [resolvable:$true] %s680_s14 }
  0x3a   : > { %v309_v0 = vld [vmem:[%s264_s16] sm:$0xff]  ;;  %v310_v1 = vld [vmem:[%s264_s16 + $0x8] sm:$0xff]  ;;  %v311_v2 = vld [vmem:[%s264_s16 + $0x10] sm:$0xff]  ;;  %s971_s11 = scalar_lea.vmem %s1218_s14, 512  ;;  %s1042_s25 = smov [#allocation5]  }
  0x3b   : > { %v857_v3 = vpack.c.bf16 %v310_v1, %v309_v0  ;;  %v312_v4 = vld [vmem:[%s264_s16 + $0x18] sm:$0xff]  ;;  %812 = vmatpush3.bf16.msra.mxu1 %v922_v11  ;;  %v929_v24 = vld [vmem:[#allocation2 + $0x68] sm:$0xff]   ;;  %v931_v26 = vld [vmem:[#allocation2 + $0x70] sm:$0xff]   ;;  %s1216_s16 = scalar_lea.hbm %s1269_s6, %s796_s13  ;;  %p972_p6 = scmp.ne.s32.totalorder %s1218_s14, %s971_s11 }
  0x3c   : > { %v861_v6 = vpack.c.bf16 %v312_v4, %v311_v2  ;;  %813 = vmatprep.subr.bf16.mxu1 %v923_v12  ;;  %v273_v23 = vld [vmem:[%s1264_s1 + $0x38] sm:$0xff]  ;;  %v930_v25 = vld [vmem:[#allocation2 + $0x28] sm:$0xff]   ;;  %v932_v27 = vld [vmem:[#allocation2 + $0x30] sm:$0xff]   ;;  %s975_s17 = sshll.u32 %s1042_s25, 4  ;;  %s976_s17 = int_to_ptr.vmem [resolvable:$false] %s975_s17 }
  0x3d   : > { %858 = vmatprep.subr.bf16.mxu0 %v857_v3  ;;  %v933_v28 = vld [vmem:[#allocation2 + $0x78] sm:$0xff]   ;;  %v771_v44 = vld [vmem:[%s1266_s3] ss:$0 sm:$0xff]  ;;  %p973_p10 = pnand %p972_p6, %p1280_p9  ;;  %s977_s19 = scalar_lea.vmem %s976_s17, 1024 }
  0x3e   : > { %860 = vmatpush3.bf16.msra.mxu0 %v857_v3  ;;  %v934_v29 = vld [vmem:[#allocation2 + $0x38] sm:$0xff]   ;;  %p978_p2 = scmp.lt.s32.totalorder %s1218_s14, %s976_s17  ;;  %p979_p3 = scmp.lt.s32.totalorder %s977_s19, %s971_s11 }
  0x3f   : > { %862 = vmatprep.subr.bf16.mxu0 %v861_v6  ;;  %814 = vmatpush3.bf16.msra.mxu1 %v924_v16  ;;  %p974_p12 = pneg %p973_p10 }
  0x40   : > { %815 = vmatprep.subr.bf16.mxu1 %v925_v17  ;;  %p980_p4 = por %p979_p3, %p978_p2 }
  0x42   : > { %864 = vmatpush3.bf16.msra.mxu0 %v861_v6  ;;  %p981_p7 = pnand %p980_p4, %p974_p12 }
  0x43   : > { %816 = vmatpush3.bf16.msra.mxu1 %v926_v18 }
  0x44   : > { %817 = vmatprep.subr.bf16.mxu1 %v927_v20 }
  0x45   : > { %846 = vmatmul.mubr.msk.f32.vlgmr.msra.gmra.mrb[0].mxu0 %vm313_vm0, %v267_v9 }
  0x46   : > { %848 = vmatprep.mubr.msk.f32.mxu0 %vm313_vm0, %v268_v13 }
  0x47   : > { %818 = vmatpush3.bf16.msra.mxu1 %v928_v22 }
  0x48   : > { %819 = vmatprep.subr.bf16.mxu1 %v929_v24 }
  0x49   : > { %849 = vmatmul.mubr.msk.f32.gmra.mrb[2].mxu0 %vm313_vm0, %v269_v14 }
  0x4a   : > { %851 = vmatprep.mubr.msk.f32.mxu0 %vm313_vm0, %v270_v15 }
  0x4b   : > { %820 = vmatpush3.bf16.msra.mxu1 %v930_v25 }
  0x4c   : > { %821 = vmatprep.subr.bf16.mxu1 %v931_v26  ;;  %v789_v26 = vld [vmem:[%s1268_s5] ss:$0 sm:$0xff] }
  0x4d   : > { %852 = vmatmul.mubr.msk.f32.gmra.mrb[4].mxu0 %vm313_vm0, %v271_v19 }
  0x4e   : > { %854 = vmatprep.mubr.msk.f32.mxu0 %vm313_vm0, %v272_v21 }
  0x4f   : > { %822 = vmatpush3.bf16.msra.mxu1 %v932_v27 }
  0x50   : > { %823 = vmatprep.subr.bf16.mxu1 %v933_v28 }
  0x51   : > { %855 = vmatmul.mubr.msk.f32.gmra.mrb[6].mxu0 %vm313_vm0, %v273_v23  ;;  %v788_v23 = vld [vmem:[%s1267_s4] ss:$0 sm:$0xff] }
  0x53   : > { %824 = vmatpush3.bf16.msra.mxu1 %v934_v29 }
 0x118   : > { %v847_v30 = vpop.f32.mrb[0].mxu0 }
 0x119   : > { %v404_v31 = vpop.f32.mrb[1].mxu0 }
 0x11a   : > { %v443_v32 = vpack.c.bf16 %v847_v30, %v404_v31 }
 0x11c   : > { %v850_v33 = vpop.f32.mrb[2].mxu0 }
 0x11d   : > { %v414_v34 = vpop.f32.mrb[3].mxu0 }
 0x11e   : > { %v445_v35 = vpack.c.bf16 %v850_v33, %v414_v34 }
 0x120   : > { %v853_v36 = vpop.f32.mrb[4].mxu0 }
 0x121   : > { %v424_v37 = vpop.f32.mrb[5].mxu0 }
 0x122   : > { %v444_v38 = vpack.c.bf16 %v853_v36, %v424_v37 }
 0x124   : > { %581 = vmatprep.mubr.bf16.mxu1 %v444_v38  ;;  %v856_v39 = vpop.f32.mrb[6].mxu0 }
 0x125   : > { %582 = vmatmul.mubr.bf16.vlgmr.msra.gmra.mrb[0].mxu1 %v443_v32  ;;  %v434_v40 = vpop.f32.mrb[7].mxu0 }
 0x126   : > { %v446_v41 = vpack.c.bf16 %v856_v39, %v434_v40 }
 0x128   : > { %589 = vmatprep.mubr.bf16.mxu1 %v446_v41 }
 0x12d   : > { %590 = vmatmul.mubr.bf16.gmra.mrb[4].mxu1 %v445_v35 }
 0x1f8   : > { %v825_v42 = vpop.f32.mrb[0].mxu1 }
 0x1f9   : > { %v826_v43 = vpop.f32.mrb[1].mxu1 }
 0x1fa   : > { %v827_v45 = vadd.f32 %v826_v43, %v825_v42  ;;  %v828_v46 = vpop.f32.mrb[2].mxu1 }
 0x1fb   : > { %v829_v47 = vpop.f32.mrb[3].mxu1 }
 0x1fc   : > { %v830_v48 = vadd.f32 %v829_v47, %v828_v46  ;;  %v584_v49 = vadd.f32 %v827_v45, %v771_v44 }
 0x1fe   : > { %598 = vadd.xlane.f32.xlu0 %v584_v49  ;;  %v587_v51 = vadd.f32 %v830_v48, %v771_v44 }
 0x200   : > { %v831_v50 = vpop.f32.mrb[4].mxu1 }
 0x201   : > { %v832_v52 = vpop.f32.mrb[5].mxu1 }
 0x202   : > { %v833_v53 = vadd.f32 %v832_v52, %v831_v50  ;;  %600 = vadd.xlane.f32.xlu0 %v587_v51  ;;  %v834_v54 = vpop.f32.mrb[6].mxu1 }
 0x203   : > { %v835_v55 = vpop.f32.mrb[7].mxu1 }
 0x204   : > { %v836_v56 = vadd.f32 %v835_v55, %v834_v54  ;;  %v592_v57 = vadd.f32 %v833_v53, %v771_v44 }
 0x206   : > { %602 = vadd.xlane.f32.xlu1 %v592_v57  ;;  %v595_v58 = vadd.f32 %v836_v56, %v771_v44 }
 0x20a   : > { %604 = vadd.xlane.f32.xlu1 %v595_v58 }
 0x28b   : > { %v599_v59 = vpop.xlane.xlu0 %598 }
 0x28c   : > { %v606_v60 = vmul.f32 0.0078125, %v599_v59 }
 0x28e   : > { %v610_v61 = vsub.f32 %v584_v49, %v606_v60 }
 0x28f   : > { %v601_v62 = vpop.xlane.xlu0 %600 }
 0x290   : > { %v607_v63 = vmul.f32 0.0078125, %v601_v62  ;;  %v614_v0 = vmul.f32 %v610_v61, %v610_v61 }
 0x292   : > { %v611_v1 = vsub.f32 %v587_v51, %v607_v63  ;;  %618 = vadd.xlane.f32.xlu0 %v614_v0 }
 0x293   : > { %v603_v2 = vpop.xlane.xlu1 %602 }
 0x294   : > { %v608_v3 = vmul.f32 0.0078125, %v603_v2  ;;  %v615_v4 = vmul.f32 %v611_v1, %v611_v1 }
 0x296   : > { %v612_v5 = vsub.f32 %v592_v57, %v608_v3  ;;  %620 = vadd.xlane.f32.xlu1 %v615_v4 }
 0x297   : > { %v605_v6 = vpop.xlane.xlu1 %604 }
 0x298   : > { %v609_v7 = vmul.f32 0.0078125, %v605_v6  ;;  %v616_v8 = vmul.f32 %v612_v5, %v612_v5 }
 0x29a   : > { %v613_v9 = vsub.f32 %v595_v58, %v609_v7  ;;  %622 = vadd.xlane.f32.xlu0 %v616_v8 }
 0x29c   : > { %v617_v10 = vmul.f32 %v613_v9, %v613_v9 }
 0x29e   : > { %624 = vadd.xlane.f32.xlu1 %v617_v10 }
 0x31f   : > { %v619_v11 = vpop.xlane.xlu0 %618 }
 0x320   : > { %v626_v12 = vmul.f32 0.0078125, %v619_v11 }
 0x322   : > { %v630_v13 = vadd.f32 1e-05, %v626_v12 }
 0x323   : > { %v621_v14 = vpop.xlane.xlu1 %620 }
 0x324   : > { %935 = vrsqrt.f32 %v630_v13  ;;  %v627_v15 = vmul.f32 0.0078125, %v621_v14 }
 0x326   : > { %v631_v16 = vadd.f32 1e-05, %v627_v15 }
 0x327   : > { %v623_v17 = vpop.xlane.xlu0 %622 }
 0x328   : > { %937 = vrsqrt.f32 %v631_v16  ;;  %v628_v18 = vmul.f32 0.0078125, %v623_v17 }
 0x32a   : > { %v632_v19 = vadd.f32 1e-05, %v628_v18 }
 0x32b   : > { %v625_v20 = vpop.xlane.xlu1 %624 }
 0x32c   : > { %939 = vrsqrt.f32 %v632_v19  ;;  %v629_v21 = vmul.f32 0.0078125, %v625_v20 }
 0x32e   : > { %v936_v22 = vpop.eup %935  ;;  %v633_v24 = vadd.f32 1e-05, %v629_v21 }
 0x32f   : > { %v638_v25 = vmul.f32 %v936_v22, %v610_v61 }
 0x330   : > { %941 = vrsqrt.f32 %v633_v24 }
 0x331   : > { %v648_v27 = vmul.f32 %v788_v23, %v638_v25 }
 0x332   : > { %v938_v28 = vpop.eup %937 }
 0x333   : > { %v658_v29 = vadd.f32 %v789_v26, %v648_v27  ;;  %v639_v30 = vmul.f32 %v938_v28, %v611_v1 }
 0x335   : > { %662 = vst [vmem:[%s259_s10] sm:$0xff] %v658_v29  ;;  %v649_v31 = vmul.f32 %v788_v23, %v639_v30 }
 0x336   : > { %v940_v32 = vpop.eup %939 }
 0x337   : > { %v659_v33 = vadd.f32 %v789_v26, %v649_v31  ;;  %v640_v34 = vmul.f32 %v940_v32, %v612_v5 }
 0x339   : > { %663 = vst [vmem:[%s259_s10 + $0x8] sm:$0xff] %v659_v33  ;;  %v650_v35 = vmul.f32 %v788_v23, %v640_v34 }
 0x33a   : > { %v942_v36 = vpop.eup %941 }
 0x33b   : > { %v660_v37 = vadd.f32 %v789_v26, %v650_v35  ;;  %v641_v38 = vmul.f32 %v942_v36, %v613_v9 }
 0x33d   : > { %664 = vst [vmem:[%s259_s10 + $0x10] sm:$0xff] %v660_v37  ;;  %v651_v39 = vmul.f32 %v788_v23, %v641_v38 }
 0x33f   : > { %v661_v40 = vadd.f32 %v789_v26, %v651_v39 }
 0x341   : > { %665 = vst [vmem:[%s259_s10 + $0x18] sm:$0xff] %v661_v40 }
 0x342   : > { %984 = shalt.err (!%p981_p7)
}
 0x343   : > { %s985_s18 = scalar_lea.hbm %s1216_s16, 512  ;;  %s989_s28 = scalar_lea.hbm %s1269_s6, 1024 }
 0x344   : > { %p986_p8 = scmp.ne.s32.totalorder %s1216_s16, %s985_s18  ;;  %p990_p1 = scmp.lt.u32.totalorder %s1216_s16, %s1269_s6 }
 0x345   : > { %p991_p0 = scmp.lt.u32.totalorder %s989_s28, %s985_s18  ;;  %p993_p6 = scmp.lt.u32.totalorder %s985_s18, %s1216_s16 }
 0x346   : > { %p987_p11 = pnand %p986_p8, %p1280_p9 }
 0x347   : > { %p992_p5 = por %p991_p0, %p990_p1 }
 0x348   : > { %p988_p13 = pneg %p987_p11 }
 0x349   : > { %p994_p10 = por %p993_p6, %p992_p5 }
 0x34b   : > { %p995_p12 = pnand %p994_p10, %p988_p13 }
 0x34d   : > { %998 = shalt.err (!%p995_p12)
}
 0x34e   : > { %s1043_s13 = smov 128   ;;  %s1044_s15 = smov 8  }
 0x34f   : > { %869 = dma.vmem_to_hbm [thread:$0]  (%p1280_p9), %s1218_s14, 512, %s1216_s16, %s1222_s9, %s1043_s13, %s1043_s13, %s1044_s15  }
 0x350 PF: > { %p881_p2 = scmp.ge.s32.totalorder %s1037_s24, 2  ;;  %s695_s12 = sand.u32 1, %s1025_s21  }
 0x351   : > { %p1281_p3 = scmp.ne.s32.totalorder %s1274_s8, 0  ;;  %s696_s11 = scalar_lea.sflag [#allocation4], %s695_s12 }
 0x353   : > { %p876_p4 = pnand %p881_p2, %p1281_p3 }
 0x355   : > { %1020 = dma.done.wait (!%p876_p4), %s696_s11, 512  }
 0x356   : > { %1022 = vsyncadd (!%p876_p4), %s696_s11, 4294966784  ;;  %p17_p7 = scmp.ge.s32.totalorder %s1105_s27, 4   ;;  %s1282_s21 = smov %s1029_s22 }
 0x357   : > { %s1283_s22 = smov %s1033_s23  ;;  %s1284_s23 = smov %s1116_s30 }
 0x358   : > { %s1285_s24 = smov %s1105_s27  ;;  %19 = sbr.rel (!%p17_p7) target bundleno = 4 (0x4), region = 84 }
 0x35f   :  { %701 = vsyncpa [#allocation3], 1 }
 0x360   :  { %703 = vsyncpa [#allocation3 + $0x1], 1 }
 0x361   :  { %704 = vsyncpa [#allocation4], 1 }
 0x362   :  { %706 = vsyncpa [#allocation4 + $0x1], 1 }

</bundles_post_ra>
